<compile_context>
chip_gen: v5e
topology: v5e:2x2
jax: 0.10.0
libtpu: 0.0.40
codegen_flags: <defaults>
</compile_context>

<pallas_src>
import jax
import jax.numpy as jnp
from jax.experimental import pallas as pl
from jax.experimental.pallas import tpu as pltpu

DROPOUT_P = 0.3
_KEEP = 1.0 - DROPOUT_P
# keep iff hash_u32 < keep * 2^32  (guard the p == 0 wraparound edge case)
_KEEP_THRESH = min(int(_KEEP * (2.0 ** 32)), 2 ** 32 - 1)

LANE = 128


def _round_up(n, m):
    return ((n + m - 1) // m) * m


def _mcdropout_kernel(seed_ref,                 # (N*B, 1) uint32, per-row seed
                      x_ref,                    # (B, Din_p) bf16
                      w1_ref, b1_ref,           # (Din_p, H_p) bf16, (1, H_p) f32
                      w2_ref, b2_ref,           # (H_p, H_p) bf16,   (1, H_p) f32
                      w3_ref, b3_ref,           # (H_p, Dout_p) bf16,(1, Dout_p) f32
                      out_ref):                 # (N*B, Dout_p) f32
    batch = x_ref.shape[0]
    nb = out_ref.shape[0]
    n_samples = nb // batch
    h_p = w1_ref.shape[1]
    dout_p = w3_ref.shape[1]

    # ---- dropout keep-masks: counter-based lowbias32 hash (pure VPU uint32 ops,
    #      lowers on real TPU and the interpreter). Counters + seed mix hoisted
    #      once; only the per-layer finalizer differs. -------------------------
    seed_col = seed_ref[...]                                        # (NB, 1)
    rows_h = jax.lax.broadcasted_iota(jnp.uint32, (nb, h_p), 0)
    cols_h = jax.lax.broadcasted_iota(jnp.uint32, (nb, h_p), 1)
    base_h = seed_col * jnp.uint32(0x9E3779B9) + rows_h * jnp.uint32(h_p) + cols_h
    if dout_p == h_p:
        base_o = base_h
    else:
        rows_o = jax.lax.broadcasted_iota(jnp.uint32, (nb, dout_p), 0)
        cols_o = jax.lax.broadcasted_iota(jnp.uint32, (nb, dout_p), 1)
        base_o = seed_col * jnp.uint32(0x9E3779B9) + rows_o * jnp.uint32(dout_p) + cols_o

    thresh = jnp.uint32(_KEEP_THRESH)

    def keep(base, layer_idx):
        h = base + jnp.uint32((layer_idx * 0x85EBCA6B) & 0xFFFFFFFF)
        h = h ^ (h >> jnp.uint32(16))
        h = h * jnp.uint32(0x7FEB352D)
        h = h ^ (h >> jnp.uint32(15))
        h = h * jnp.uint32(0x846CA68B)
        h = h ^ (h >> jnp.uint32(16))
        return h < thresh

    # ---- layer 1: pre-activation is seed-independent -> compute once on the
    #      B un-replicated rows, then tile across the N sample blocks. --------
    z1 = jnp.dot(x_ref[...], w1_ref[...],
                 preferred_element_type=jnp.float32) + b1_ref[...]   # (B, H_p)
    z1 = jnp.concatenate([z1] * n_samples, axis=0)                   # (NB, H_p)
    # relu(dropout(z)) == where(keep, relu(z), 0)  (1/(1-p) folded into W, b)
    h1 = jnp.where(keep(base_h, 1), jnp.maximum(z1, 0.0), 0.0)

    # ---- layer 2 ------------------------------------------------------------
    z2 = jnp.dot(h1.astype(jnp.bfloat16), w2_ref[...],
                 preferred_element_type=jnp.float32) + b2_ref[...]
    h2 = jnp.where(keep(base_h, 2), jnp.maximum(z2, 0.0), 0.0)

    # ---- layer 3 + single lane-dense store ----------------------------------
    z3 = jnp.dot(h2.astype(jnp.bfloat16), w3_ref[...],
                 preferred_element_type=jnp.float32) + b3_ref[...]
    out_ref[...] = jnp.where(keep(base_o, 3), jnp.maximum(z3, 0.0), 0.0)


@jax.jit
def mcdropout_forward(x, w1, b1, w2, b2, w3, b3, seeds):
    """Runs len(seeds) MC-dropout forward passes in ONE fused, grid-less pallas_call.

    x:      [B, Din] float32
    w*:     [fan_in, fan_out] bfloat16 (pre-scaled by 1/(1-p))
    b*:     [1, fan_out] float32      (pre-scaled by 1/(1-p))
    seeds:  [N] int32 (seed for sample k == i_k + 42)
    returns [N, B, Dout] float32
    """
    B, Din = x.shape
    H = w1.shape[1]
    Dout = w3.shape[1]
    N = seeds.shape[0]
    NB = N * B

    # Pad every feature axis to the 128-lane width (zero padding is exact:
    # padded columns stay identically zero through matmul + dropout + relu).
    Din_p, H_p, Dout_p = _round_up(Din, LANE), _round_up(H, LANE), _round_up(Dout, LANE)

    def pad2(a, r, c, dtype):
        return jnp.zeros((r, c), dtype).at[:a.shape[0], :a.shape[1]].set(a.astype(dtype))

    xp = pad2(x, B, Din_p, jnp.bfloat16)            # pre-cast to bf16 in the wrapper
    w1p = pad2(w1, Din_p, H_p, jnp.bfloat16)
    w2p = pad2(w2, H_p, H_p, jnp.bfloat16)
    w3p = pad2(w3, H_p, Dout_p, jnp.bfloat16)
    b1p = pad2(b1, 1, H_p, jnp.float32)
    b2p = pad2(b2, 1, H_p, jnp.float32)
    b3p = pad2(b3, 1, Dout_p, jnp.float32)

    # Per-row seed column: sample k's seed repeated across its B rows.
    seed_col = jnp.repeat(seeds.astype(jnp.uint32), B).reshape(NB, 1)

    vmem_spec = pl.BlockSpec(memory_space=pltpu.MemorySpace.VMEM)

    out = pl.pallas_call(
        _mcdropout_kernel,
        out_shape=jax.ShapeDtypeStruct((NB, Dout_p), jnp.float32),
        in_specs=[vmem_spec] * 8,
        out_specs=vmem_spec,
    )(seed_col, xp, w1p, b1p, w2p, b2p, w3p, b3p)

    return out.reshape(N, B, Dout_p)[:, :, :Dout]


def init_params(key, input_dim, hidden_dim, output_dim, dropout_p=DROPOUT_P):
    """PyTorch Linear default init U(-1/sqrt(fan_in), 1/sqrt(fan_in)),
    with the 1/(1-p) dropout scale folded into w and b once (host-side),
    weights stored as bf16."""
    inv_keep = 1.0 / (1.0 - dropout_p)

    def linear(k, fan_in, fan_out):
        kw, kb = jax.random.split(k)
        bound = 1.0 / jnp.sqrt(fan_in)
        w = jax.random.uniform(kw, (fan_in, fan_out), jnp.float32, -bound, bound)
        b = jax.random.uniform(kb, (1, fan_out), jnp.float32, -bound, bound)
        return (w * inv_keep).astype(jnp.bfloat16), b * inv_keep

    k1, k2, k3 = jax.random.split(key, 3)
    w1, b1 = linear(k1, input_dim, hidden_dim)
    w2, b2 = linear(k2, hidden_dim, hidden_dim)
    w3, b3 = linear(k3, hidden_dim, output_dim)
    return w1, b1, w2, b2, w3, b3


if __name__ == "__main__":
    input_dim, hidden_dim, output_dim = 32, 32, 16
    batch = 8
    num_samples = 8            # MC-dropout samples fused into one pallas_call

    key = jax.random.PRNGKey(0)
    kx, kp = jax.random.split(key)
    x = jax.random.normal(kx, (batch, input_dim), dtype=jnp.float32)
    params = init_params(kp, input_dim, hidden_dim, output_dim)

    # forward(x, i) seeds with i + 42 ; sample k uses i = k+1.
    seeds = jnp.arange(1, num_samples + 1, dtype=jnp.int32) + 42

    out = mcdropout_forward(x, *params, seeds)
    jax.block_until_ready(out)

    assert out.shape == (num_samples, batch, output_dim)
    assert out.dtype == jnp.float32
    assert bool(jnp.all(out >= 0.0))              # ReLU output
    assert bool(jnp.all(jnp.isfinite(out)))
    # different seeds must give different dropout masks -> different samples
    assert bool(jnp.any(out[0] != out[1]))

    print("KERNEL_OK")
</pallas_src>

<mosaic_0001>
module attributes {stable_mosaic.version = 11 : i64} {
  func.func @_mcdropout_kernel(%arg0: memref<64x1xi32, #tpu.memory_space<vmem>>, %arg1: memref<8x128xbf16, #tpu.memory_space<vmem>>, %arg2: memref<128x128xbf16, #tpu.memory_space<vmem>>, %arg3: memref<1x128xf32, #tpu.memory_space<vmem>>, %arg4: memref<128x128xbf16, #tpu.memory_space<vmem>>, %arg5: memref<1x128xf32, #tpu.memory_space<vmem>>, %arg6: memref<128x128xbf16, #tpu.memory_space<vmem>>, %arg7: memref<1x128xf32, #tpu.memory_space<vmem>>, %arg8: memref<64x128xf32, #tpu.memory_space<vmem>>) attributes {dimension_semantics = [], scalar_prefetch = 0 : i64, scratch_operands = 0 : i64, tpu.core_type = #tpu.core_type<tc>} {
    %c0 = arith.constant 0 : index
    %c0_0 = arith.constant 0 : index
    %0 = vector.load %arg0[%c0, %c0_0] : memref<64x1xi32, #tpu.memory_space<vmem>>, vector<64x1xi32>
    %1 = tpu.iota {dimensions = array<i32: 0>} : vector<64x128xi32>
    %2 = tpu.iota {dimensions = array<i32: 1>} : vector<64x128xi32>
    %c-1640531527_i32 = arith.constant -1640531527 : i32
    %3 = vector.broadcast %c-1640531527_i32 : i32 to vector<64x1xi32>
    %4 = arith.muli %0, %3 : vector<64x1xi32>
    %c128_i32 = arith.constant 128 : i32
    %5 = vector.broadcast %c128_i32 : i32 to vector<64x128xi32>
    %6 = arith.muli %1, %5 : vector<64x128xi32>
    %7 = vector.broadcast %4 : vector<64x1xi32> to vector<64x128xi32>
    %8 = arith.addi %7, %6 : vector<64x128xi32>
    %9 = arith.addi %8, %2 : vector<64x128xi32>
    %c0_1 = arith.constant 0 : index
    %c0_2 = arith.constant 0 : index
    %10 = vector.load %arg1[%c0_1, %c0_2] : memref<8x128xbf16, #tpu.memory_space<vmem>>, vector<8x128xbf16>
    %c0_3 = arith.constant 0 : index
    %c0_4 = arith.constant 0 : index
    %11 = vector.load %arg2[%c0_3, %c0_4] : memref<128x128xbf16, #tpu.memory_space<vmem>>, vector<128x128xbf16>
    %cst = arith.constant dense<0.000000e+00> : vector<8x128xf32>
    %12 = tpu.matmul %10, %11, %cst {dimension_numbers = #tpu.dot_dimension_numbers<[1], [0], [0], [1], [0, 0, 1, 1], [], []>} : vector<8x128xbf16>, vector<128x128xbf16>, vector<8x128xf32> -> vector<8x128xf32>
    %c0_5 = arith.constant 0 : index
    %c0_6 = arith.constant 0 : index
    %13 = vector.load %arg3[%c0_5, %c0_6] : memref<1x128xf32, #tpu.memory_space<vmem>>, vector<1x128xf32>
    %14 = vector.broadcast %13 : vector<1x128xf32> to vector<8x128xf32>
    %15 = arith.addf %12, %14 : vector<8x128xf32>
    %16 = tpu.concatenate %15, %15, %15, %15, %15, %15, %15, %15 in 0 : vector<8x128xf32>, vector<8x128xf32>, vector<8x128xf32>, vector<8x128xf32>, vector<8x128xf32>, vector<8x128xf32>, vector<8x128xf32>, vector<8x128xf32> -> vector<64x128xf32>
    %c-2048144789_i32 = arith.constant -2048144789 : i32
    %17 = vector.broadcast %c-2048144789_i32 : i32 to vector<64x128xi32>
    %18 = arith.addi %9, %17 : vector<64x128xi32>
    %c16_i32 = arith.constant 16 : i32
    %19 = vector.broadcast %c16_i32 : i32 to vector<64x128xi32>
    %20 = arith.shrui %18, %19 : vector<64x128xi32>
    %21 = arith.xori %18, %20 : vector<64x128xi32>
    %c2146121005_i32 = arith.constant 2146121005 : i32
    %22 = vector.broadcast %c2146121005_i32 : i32 to vector<64x128xi32>
    %23 = arith.muli %21, %22 : vector<64x128xi32>
    %c15_i32 = arith.constant 15 : i32
    %24 = vector.broadcast %c15_i32 : i32 to vector<64x128xi32>
    %25 = arith.shrui %23, %24 : vector<64x128xi32>
    %26 = arith.xori %23, %25 : vector<64x128xi32>
    %c-2073254261_i32 = arith.constant -2073254261 : i32
    %27 = vector.broadcast %c-2073254261_i32 : i32 to vector<64x128xi32>
    %28 = arith.muli %26, %27 : vector<64x128xi32>
    %c16_i32_7 = arith.constant 16 : i32
    %29 = vector.broadcast %c16_i32_7 : i32 to vector<64x128xi32>
    %30 = arith.shrui %28, %29 : vector<64x128xi32>
    %31 = arith.xori %28, %30 : vector<64x128xi32>
    %c-1288490189_i32 = arith.constant -1288490189 : i32
    %32 = vector.broadcast %c-1288490189_i32 : i32 to vector<64x128xi32>
    %33 = arith.cmpi ult, %31, %32 : vector<64x128xi32>
    %cst_8 = arith.constant 0.000000e+00 : f32
    %34 = vector.broadcast %cst_8 : f32 to vector<64x128xf32>
    %35 = arith.maximumf %16, %34 : vector<64x128xf32>
    %cst_9 = arith.constant 0.000000e+00 : f32
    %36 = vector.broadcast %cst_9 : f32 to vector<64x128xf32>
    %37 = arith.select %33, %35, %36 : vector<64x128xi1>, vector<64x128xf32>
    %38 = arith.truncf %37 : vector<64x128xf32> to vector<64x128xbf16>
    %c0_10 = arith.constant 0 : index
    %c0_11 = arith.constant 0 : index
    %39 = vector.load %arg4[%c0_10, %c0_11] : memref<128x128xbf16, #tpu.memory_space<vmem>>, vector<128x128xbf16>
    %cst_12 = arith.constant dense<0.000000e+00> : vector<64x128xf32>
    %40 = tpu.matmul %38, %39, %cst_12 {dimension_numbers = #tpu.dot_dimension_numbers<[1], [0], [0], [1], [0, 0, 1, 1], [], []>} : vector<64x128xbf16>, vector<128x128xbf16>, vector<64x128xf32> -> vector<64x128xf32>
    %c0_13 = arith.constant 0 : index
    %c0_14 = arith.constant 0 : index
    %41 = vector.load %arg5[%c0_13, %c0_14] : memref<1x128xf32, #tpu.memory_space<vmem>>, vector<1x128xf32>
    %42 = vector.broadcast %41 : vector<1x128xf32> to vector<64x128xf32>
    %43 = arith.addf %40, %42 : vector<64x128xf32>
    %c198677718_i32 = arith.constant 198677718 : i32
    %44 = vector.broadcast %c198677718_i32 : i32 to vector<64x128xi32>
    %45 = arith.addi %9, %44 : vector<64x128xi32>
    %c16_i32_15 = arith.constant 16 : i32
    %46 = vector.broadcast %c16_i32_15 : i32 to vector<64x128xi32>
    %47 = arith.shrui %45, %46 : vector<64x128xi32>
    %48 = arith.xori %45, %47 : vector<64x128xi32>
    %c2146121005_i32_16 = arith.constant 2146121005 : i32
    %49 = vector.broadcast %c2146121005_i32_16 : i32 to vector<64x128xi32>
    %50 = arith.muli %48, %49 : vector<64x128xi32>
    %c15_i32_17 = arith.constant 15 : i32
    %51 = vector.broadcast %c15_i32_17 : i32 to vector<64x128xi32>
    %52 = arith.shrui %50, %51 : vector<64x128xi32>
    %53 = arith.xori %50, %52 : vector<64x128xi32>
    %c-2073254261_i32_18 = arith.constant -2073254261 : i32
    %54 = vector.broadcast %c-2073254261_i32_18 : i32 to vector<64x128xi32>
    %55 = arith.muli %53, %54 : vector<64x128xi32>
    %c16_i32_19 = arith.constant 16 : i32
    %56 = vector.broadcast %c16_i32_19 : i32 to vector<64x128xi32>
    %57 = arith.shrui %55, %56 : vector<64x128xi32>
    %58 = arith.xori %55, %57 : vector<64x128xi32>
    %c-1288490189_i32_20 = arith.constant -1288490189 : i32
    %59 = vector.broadcast %c-1288490189_i32_20 : i32 to vector<64x128xi32>
    %60 = arith.cmpi ult, %58, %59 : vector<64x128xi32>
    %cst_21 = arith.constant 0.000000e+00 : f32
    %61 = vector.broadcast %cst_21 : f32 to vector<64x128xf32>
    %62 = arith.maximumf %43, %61 : vector<64x128xf32>
    %cst_22 = arith.constant 0.000000e+00 : f32
    %63 = vector.broadcast %cst_22 : f32 to vector<64x128xf32>
    %64 = arith.select %60, %62, %63 : vector<64x128xi1>, vector<64x128xf32>
    %65 = arith.truncf %64 : vector<64x128xf32> to vector<64x128xbf16>
    %c0_23 = arith.constant 0 : index
    %c0_24 = arith.constant 0 : index
    %66 = vector.load %arg6[%c0_23, %c0_24] : memref<128x128xbf16, #tpu.memory_space<vmem>>, vector<128x128xbf16>
    %cst_25 = arith.constant dense<0.000000e+00> : vector<64x128xf32>
    %67 = tpu.matmul %65, %66, %cst_25 {dimension_numbers = #tpu.dot_dimension_numbers<[1], [0], [0], [1], [0, 0, 1, 1], [], []>} : vector<64x128xbf16>, vector<128x128xbf16>, vector<64x128xf32> -> vector<64x128xf32>
    %c0_26 = arith.constant 0 : index
    %c0_27 = arith.constant 0 : index
    %68 = vector.load %arg7[%c0_26, %c0_27] : memref<1x128xf32, #tpu.memory_space<vmem>>, vector<1x128xf32>
    %69 = vector.broadcast %68 : vector<1x128xf32> to vector<64x128xf32>
    %70 = arith.addf %67, %69 : vector<64x128xf32>
    %c-1849467071_i32 = arith.constant -1849467071 : i32
    %71 = vector.broadcast %c-1849467071_i32 : i32 to vector<64x128xi32>
    %72 = arith.addi %9, %71 : vector<64x128xi32>
    %c16_i32_28 = arith.constant 16 : i32
    %73 = vector.broadcast %c16_i32_28 : i32 to vector<64x128xi32>
    %74 = arith.shrui %72, %73 : vector<64x128xi32>
    %75 = arith.xori %72, %74 : vector<64x128xi32>
    %c2146121005_i32_29 = arith.constant 2146121005 : i32
    %76 = vector.broadcast %c2146121005_i32_29 : i32 to vector<64x128xi32>
    %77 = arith.muli %75, %76 : vector<64x128xi32>
    %c15_i32_30 = arith.constant 15 : i32
    %78 = vector.broadcast %c15_i32_30 : i32 to vector<64x128xi32>
    %79 = arith.shrui %77, %78 : vector<64x128xi32>
    %80 = arith.xori %77, %79 : vector<64x128xi32>
    %c-2073254261_i32_31 = arith.constant -2073254261 : i32
    %81 = vector.broadcast %c-2073254261_i32_31 : i32 to vector<64x128xi32>
    %82 = arith.muli %80, %81 : vector<64x128xi32>
    %c16_i32_32 = arith.constant 16 : i32
    %83 = vector.broadcast %c16_i32_32 : i32 to vector<64x128xi32>
    %84 = arith.shrui %82, %83 : vector<64x128xi32>
    %85 = arith.xori %82, %84 : vector<64x128xi32>
    %c-1288490189_i32_33 = arith.constant -1288490189 : i32
    %86 = vector.broadcast %c-1288490189_i32_33 : i32 to vector<64x128xi32>
    %87 = arith.cmpi ult, %85, %86 : vector<64x128xi32>
    %cst_34 = arith.constant 0.000000e+00 : f32
    %88 = vector.broadcast %cst_34 : f32 to vector<64x128xf32>
    %89 = arith.maximumf %70, %88 : vector<64x128xf32>
    %cst_35 = arith.constant 0.000000e+00 : f32
    %90 = vector.broadcast %cst_35 : f32 to vector<64x128xf32>
    %91 = arith.select %87, %89, %90 : vector<64x128xi1>, vector<64x128xf32>
    %c0_36 = arith.constant 0 : index
    %c0_37 = arith.constant 0 : index
    %92 = vector.load %arg8[%c0_36, %c0_37] : memref<64x128xf32, #tpu.memory_space<vmem>>, vector<64x128xf32>
    tpu.vector_store %arg8[%c0_36, %c0_37], %91 {strides = array<i32>} : memref<64x128xf32, #tpu.memory_space<vmem>>, vector<64x128xf32>,
    return
  }
}

</mosaic_0001>

<bundles_post_ra>
// kernel: mcdropout_forward.1
= control target key start
LH: loop header
LB: loop body
LE: loop exit
PB: predicated region body
PF: predicated region fallthrough
CT: control target
= control target key end

     0   :  { %v964_v3 = vmov 0   ;;  %s1318_s0 = inlined_call_operand.vmem [shape: u32[64,1], index: 0, kind: input, shape index: {}]   ;;  %s1319_s1 = inlined_call_operand.vmem [shape: bf16[8,128], index: 1, kind: input, shape index: {}]   ;;  %s1320_s2 = inlined_call_operand.vmem [shape: bf16[128,128], index: 2, kind: input, shape index: {}]   ;;  %s1321_s3 = inlined_call_operand.vmem [shape: f32[1,128], index: 3, kind: input, shape index: {}]   ;;  %s1322_s4 = inlined_call_operand.vmem [shape: bf16[128,128], index: 4, kind: input, shape index: {}]   ;;  %s1323_s5 = inlined_call_operand.vmem [shape: f32[1,128], index: 5, kind: input, shape index: {}]   ;;  %s1324_s6 = inlined_call_operand.vmem [shape: bf16[128,128], index: 6, kind: input, shape index: {}]   ;;  %s1325_s7 = inlined_call_operand.vmem [shape: f32[1,128], index: 7, kind: input, shape index: {}]   ;;  %s1326_s8 = inlined_call_operand.hbm [shape: f32[64,128], index: 8, kind: output, shape index: {}]  }
   0x1   :  { %v895_v0 = vld [vmem:[%s1320_s2 + $0x38] sm:$0xff]  ;;  %v34_v1 = vld [vmem:[%s1318_s0 + $0x20] sm:$0xff]  ;;  %v32_v2 = vld [vmem:[%s1318_s0 + $0x10] sm:$0xff]  ;;  %933 = vset.pattern.permute.xlu1 %v964_v3  ;;  %932 = vset.pattern.permute.xlu0 %v964_v3 }
   0x2   :  { %v53_v4 = vmul.u32 2654435769, %v34_v1  ;;  %v51_v5 = vmul.u32 2654435769, %v32_v2  ;;  %174 = vmatpush.bf16.msra.mxu0 %v895_v0  ;;  %v894_v6 = vld [vmem:[%s1320_s2 + $0x30] sm:$0xff]  ;;  %934 = vset.pattern.permute.xlu2 %v964_v3  ;;  %v35_v7 = vld [vmem:[%s1318_s0 + $0x28] sm:$0xff] }
   0x3   :  { %v33_v8 = vld [vmem:[%s1318_s0 + $0x18] sm:$0xff]  ;;  %v36_v9 = vld [vmem:[%s1318_s0 + $0x30] sm:$0xff]  ;;  %v893_v10 = vld [vmem:[%s1320_s2 + $0x28] sm:$0xff]  ;;  %v54_v11 = vmul.u32 2654435769, %v35_v7 }
   0x4   :  { %78 = vperm.xlu1 %933, %v53_v4   ;;  %72 = vperm.xlu0 %932, %v51_v5   ;;  %v55_v12 = vmul.u32 2654435769, %v36_v9  ;;  %v52_v13 = vmul.u32 2654435769, %v33_v8 }
   0x6   :  { %175 = vmatpush.bf16.msra.mxu0 %v894_v6  ;;  %84 = vperm.xlu2 %934, %v55_v12  }
   0x7   :  { %13 = vsyncpa [#allocation3], 0  ;;  %v37_v14 = vld [vmem:[%s1318_s0 + $0x38] sm:$0xff]  ;;  %v892_v15 = vld [vmem:[%s1320_s2 + $0x20] sm:$0xff]  ;;  %v38_v27 = vlaneseq  ;;  %s732_s26 = sshll.u32 %s1326_s8, 4  ;;  %s966_s27 = smov 128   ;;  %s733_s26 = int_to_ptr.hbm [resolvable:$true] %s732_s26 }
   0x8   :  { %v31_v16 = vld [vmem:[%s1318_s0 + $0x8] sm:$0xff]  ;;  %v30_v17 = vld [vmem:[%s1318_s0] sm:$0xff]  ;;  %v56_v18 = vmul.u32 2654435769, %v37_v14  ;;  %v891_v19 = vld [vmem:[%s1320_s2 + $0x18] sm:$0xff]  ;;  %s967_s28 = smov 8  }
   0x9   :  { %v50_v20 = vmul.u32 2654435769, %v31_v16  ;;  %v49_v21 = vmul.u32 2654435769, %v30_v17  ;;  %v890_v22 = vld [vmem:[%s1320_s2 + $0x10] sm:$0xff]  ;;  %v889_v23 = vld [vmem:[%s1320_s2 + $0x8] sm:$0xff] }
   0xa   :  { %176 = vmatpush.bf16.msra.mxu0 %v893_v10  ;;  %v888_v24 = vld [vmem:[%s1320_s2] sm:$0xff]  ;;  %v903_v26 = vld [vmem:[%s1322_s4 + $0x38] sm:$0xff]  ;;  %v902_v28 = vld [vmem:[%s1322_s4 + $0x30] sm:$0xff]  ;;  %v39_v29 = vshrl.u32 %v38_v27, 7  ;;  %v1079_v36 = vand.u32 127, %v38_v27 }
   0xb   :  { %v105_v25 = vld [vmem:[%s1319_s1] sm:$0xf]  ;;  %364 = vmatpush.bf16.msra.mxu1 %v903_v26  ;;  %912 = vmatpush.bf16.msra.mxu3 %v903_v26  ;;  %v901_v30 = vld [vmem:[%s1322_s4 + $0x28] sm:$0xff]  ;;  %v899_v35 = vld [vmem:[%s1322_s4 + $0x18] sm:$0xff] }
   0xc   :  { %81 = vperm.xlu1 %933, %v54_v11   ;;  %75 = vperm.xlu0 %932, %v52_v13   ;;  %v41_v31 = vadd.s32 16, %v39_v29  ;;  %v900_v32 = vld [vmem:[%s1322_s4 + $0x20] sm:$0xff]  ;;  %v43_v33 = vadd.s32 32, %v39_v29  ;;  %v44_v41 = vadd.s32 40, %v39_v29  ;;  %v42_v42 = vadd.s32 24, %v39_v29  ;;  %v898_v43 = vld [vmem:[%s1322_s4 + $0x10] sm:$0xff] }
   0xd   :  { %v40_v52 = vadd.s32 8, %v39_v29  ;;  %v897_v53 = vld [vmem:[%s1322_s4 + $0x8] sm:$0xff]  ;;  %v45_v57 = vadd.s32 48, %v39_v29  ;;  %v46_v61 = vadd.s32 56, %v39_v29  ;;  %v57_v0 = vmul.u32 128, %v39_v29  ;;  %v896_v5 = vld [vmem:[%s1322_s4] sm:$0xff] }
   0xe   :  { %177 = vmatpush.bf16.msra.mxu0 %v892_v15  ;;  %87 = vperm.xlu2 %934, %v56_v18   ;;  %v59_v34 = vmul.u32 128, %v41_v31  ;;  %v61_v39 = vmul.u32 128, %v43_v33  ;;  %v62_v46 = vmul.u32 128, %v44_v41  ;;  %v60_v47 = vmul.u32 128, %v42_v42 }
   0xf   :  { %365 = vmatpush.bf16.msra.mxu1 %v902_v28  ;;  %913 = vmatpush.bf16.msra.mxu3 %v902_v28  ;;  %v58_v63 = vmul.u32 128, %v40_v52  ;;  %v63_v1 = vmul.u32 128, %v45_v57  ;;  %v64_v9 = vmul.u32 128, %v46_v61 }
  0x12   :  { %178 = vmatpush.bf16.msra.mxu0 %v891_v19 }
  0x13   :  { %366 = vmatpush.bf16.msra.mxu1 %v901_v30  ;;  %914 = vmatpush.bf16.msra.mxu3 %v901_v30 }
  0x14   :  { %69 = vperm.xlu1 %933, %v50_v20   ;;  %66 = vperm.xlu0 %932, %v49_v21  }
  0x16   :  { %179 = vmatpush.bf16.msra.mxu0 %v890_v22 }
  0x17   :  { %367 = vmatpush.bf16.msra.mxu1 %v900_v32  ;;  %915 = vmatpush.bf16.msra.mxu3 %v900_v32 }
  0x1a   :  { %180 = vmatpush.bf16.msra.mxu0 %v889_v23 }
  0x1b   :  { %368 = vmatpush.bf16.msra.mxu1 %v899_v35  ;;  %916 = vmatpush.bf16.msra.mxu3 %v899_v35 }
  0x1e   :  { %181 = vmatpush.bf16.msra.mxu0 %v888_v24 }
  0x1f   :  { %369 = vmatpush.bf16.msra.mxu1 %v898_v43  ;;  %917 = vmatpush.bf16.msra.mxu3 %v898_v43 }
  0x21   :  { %182 = vmatmul.bf16.vlgmr.msra.gmra.mxu0 %v105_v25 }
  0x23   :  { %370 = vmatpush.bf16.msra.mxu1 %v897_v53  ;;  %918 = vmatpush.bf16.msra.mxu3 %v897_v53 }
  0x27   :  { %371 = vmatpush.bf16.msra.mxu1 %v896_v5  ;;  %919 = vmatpush.bf16.msra.mxu3 %v896_v5 }
  0x60   :  { %v85_v49 = vpop.permute.xlu2 %84 }
  0x61   :  { %v95_v13 = vadd.s32 %v85_v49, %v63_v1 }
  0x63   :  { %v1115_v25 = vadd.s32 %v95_v13, %v1079_v36 }
  0x65   :  { %v1128_v52 = vadd.s32 198677718, %v1115_v25 }
  0x68   :  { %v88_v14 = vpop.permute.xlu2 %87 }
  0x69   :  { %v96_v20 = vadd.s32 %v88_v14, %v64_v9 }
  0x76   :  { %v79_v37 = vpop.permute.xlu1 %78  ;;  %v73_v38 = vpop.permute.xlu0 %72 }
  0x77   :  { %v91_v40 = vadd.s32 %v73_v38, %v59_v34  ;;  %v93_v45 = vadd.s32 %v79_v37, %v61_v39  ;;  %v1123_v38 = vadd.s32 %v96_v20, %v1079_v36 }
  0x79   :  { %v1085_v44 = vadd.s32 %v91_v40, %v1079_v36  ;;  %v1092_v54 = vadd.s32 %v93_v45, %v1079_v36  ;;  %v193_v45 = vadd.s32 2246822507, %v1115_v25  ;;  %v1135_v9 = vadd.s32 198677718, %v1123_v38 }
  0x7b   :  { %v189_v48 = vadd.s32 2246822507, %v1085_v44  ;;  %v191_v62 = vadd.s32 2246822507, %v1092_v54  ;;  %v1120_v31 = vadd.s32 198677718, %v1092_v54 }
  0x7d   :  { %v197_v58 = vshrl.u32 %v189_v48, 16  ;;  %v199_v10 = vshrl.u32 %v191_v62, 16 }
  0x7e   :  { %v82_v50 = vpop.permute.xlu1 %81  ;;  %v76_v51 = vpop.permute.xlu0 %75 }
  0x7f   :  { %v94_v55 = vadd.s32 %v82_v50, %v62_v46  ;;  %v92_v56 = vadd.s32 %v76_v51, %v60_v47  ;;  %v205_v4 = vxor.u32 %v197_v58, %v189_v48  ;;  %v207_v26 = vxor.u32 %v199_v10, %v191_v62 }
  0x80   :  { %v395_v48 = vadd.s32 198677718, %v1085_v44 }
  0x81   :  { %v1095_v59 = vadd.s32 %v94_v55, %v1079_v36  ;;  %v1098_v60 = vadd.s32 %v92_v56, %v1079_v36  ;;  %v213_v17 = vmul.u32 2146121005, %v205_v4  ;;  %v215_v42 = vmul.u32 2146121005, %v207_v26 }
  0x82   :  { %v405_v55 = vshrl.u32 %v1120_v31, 16  ;;  %v403_v1 = vshrl.u32 %v395_v48, 16 }
  0x83   :  { %v192_v2 = vadd.s32 2246822507, %v1095_v59  ;;  %v190_v3 = vadd.s32 2246822507, %v1098_v60  ;;  %v221_v22 = vshrl.u32 %v213_v17, 15  ;;  %v223_v58 = vshrl.u32 %v215_v42, 15 }
  0x85   :  { %v198_v6 = vshrl.u32 %v190_v3, 16  ;;  %v200_v15 = vshrl.u32 %v192_v2, 16  ;;  %v229_v29 = vxor.u32 %v221_v22, %v213_v17  ;;  %v398_v17 = vadd.s32 198677718, %v1095_v59 }
  0x86   :  { %v70_v7 = vpop.permute.xlu1 %69  ;;  %v67_v8 = vpop.permute.xlu0 %66  ;;  %v411_v22 = vxor.u32 %v403_v1, %v395_v48 }
  0x87   :  { %v90_v11 = vadd.s32 %v70_v7, %v58_v63  ;;  %v89_v12 = vadd.s32 %v67_v8, %v57_v0  ;;  %v206_v16 = vxor.u32 %v198_v6, %v190_v3  ;;  %v208_v30 = vxor.u32 %v200_v15, %v192_v2 }
  0x88   :  { %v237_v41 = vmul.u32 2221713035, %v229_v29  ;;  %v396_v2 = vadd.s32 198677718, %v1098_v60  ;;  %v201_v3 = vshrl.u32 %v193_v45, 16  ;;  %v407_v6 = vshrl.u32 %v1128_v52, 16 }
  0x89   :  { %v1107_v18 = vadd.s32 %v90_v11, %v1079_v36  ;;  %v1110_v19 = vadd.s32 %v89_v12, %v1079_v36  ;;  %v214_v21 = vmul.u32 2146121005, %v206_v16  ;;  %v216_v47 = vmul.u32 2146121005, %v208_v30 }
  0x8a   :  { %v194_v36 = vadd.s32 2246822507, %v1123_v38  ;;  %v245_v57 = vshrl.u32 %v237_v41, 16  ;;  %v1137_v12 = vxor.u32 %v223_v58, %v215_v42  ;;  %v404_v20 = vshrl.u32 %v396_v2, 16 }
  0x8b   :  { %v188_v23 = vadd.s32 2246822507, %v1107_v18  ;;  %v394_v24 = vadd.s32 198677718, %v1107_v18  ;;  %v187_v27 = vadd.s32 2246822507, %v1110_v19 }
  0x8c   :  { %v393_v28 = vadd.s32 198677718, %v1110_v19  ;;  %v222_v33 = vshrl.u32 %v214_v21, 15  ;;  %v224_v0 = vshrl.u32 %v216_v47, 15  ;;  %v202_v7 = vshrl.u32 %v194_v36, 16 }
  0x8d   :  { %v196_v32 = vshrl.u32 %v188_v23, 16  ;;  %v402_v34 = vshrl.u32 %v394_v24, 16  ;;  %v195_v35 = vshrl.u32 %v187_v27, 16  ;;  %v253_v11 = vxor.u32 %v245_v57, %v237_v41 }
  0x8e   :  { %v401_v37 = vshrl.u32 %v393_v28, 16  ;;  %v230_v40 = vxor.u32 %v222_v33, %v214_v21  ;;  %v1139_v15 = vxor.u32 %v224_v0, %v216_v47  ;;  %v1144_v26 = vxor.u32 %v202_v7, %v194_v36  ;;  %v935_v33 = vld [vmem:[%s1321_s3] ss:$0 sm:$0xff] }
  0x8f   :  { %v204_v39 = vxor.u32 %v196_v32, %v188_v23  ;;  %v203_v46 = vxor.u32 %v195_v35, %v187_v27  ;;  %v410_v51 = vxor.u32 %v402_v34, %v394_v24  ;;  %v1142_v24 = vxor.u32 %v201_v3, %v193_v45 }
  0x90   :  { %v409_v43 = vxor.u32 %v401_v37, %v393_v28  ;;  %v238_v50 = vmul.u32 2221713035, %v230_v40  ;;  %v778_v29 = vxor.u32 2147483648, %v253_v11  ;;  %v239_v30 = vmul.u32 2221713035, %v1137_v12 }
  0x91   :  { %v212_v49 = vmul.u32 2146121005, %v204_v39  ;;  %v211_v53 = vmul.u32 2146121005, %v203_v46  ;;  %v418_v5 = vmul.u32 2146121005, %v410_v51 }
  0x92   :  { %v417_v61 = vmul.u32 2146121005, %v409_v43  ;;  %v246_v63 = vshrl.u32 %v238_v50, 16  ;;  %v240_v37 = vmul.u32 2221713035, %v1139_v15  ;;  %v406_v40 = vshrl.u32 %v398_v17, 16 }
  0x93   :  { %v220_v56 = vshrl.u32 %v212_v49, 15  ;;  %v219_v62 = vshrl.u32 %v211_v53, 15  ;;  %v426_v27 = vshrl.u32 %v418_v5, 15  ;;  %v412_v43 = vxor.u32 %v404_v20, %v396_v2 }
  0x94   :  { %v254_v14 = vxor.u32 %v246_v63, %v238_v50  ;;  %v425_v16 = vshrl.u32 %v417_v61, 15  ;;  %v408_v45 = vshrl.u32 %v1135_v9, 16  ;;  %v217_v47 = vmul.u32 2146121005, %v1142_v24 }
  0x95   :  { %v228_v4 = vxor.u32 %v220_v56, %v212_v49  ;;  %v227_v8 = vxor.u32 %v219_v62, %v211_v53  ;;  %v434_v39 = vxor.u32 %v426_v27, %v418_v5  ;;  %vm1153_vm0 = vcmp.lt.s32.totalorder %v778_v29, 858993459  ;;  %v910_v27 = vld [vmem:[%s1324_s6 + $0x30] sm:$0xff] }
  0x96   :  { %v433_v32 = vxor.u32 %v425_v16, %v417_v61  ;;  %v779_v35 = vxor.u32 2147483648, %v254_v14  ;;  %v247_v51 = vshrl.u32 %v239_v30, 16  ;;  %v218_v36 = vmul.u32 2146121005, %v1144_v26 }
  0x97   :  { %v236_v10 = vmul.u32 2221713035, %v228_v4  ;;  %v235_v13 = vmul.u32 2221713035, %v227_v8  ;;  %v442_v48 = vmul.u32 2221713035, %v434_v39  ;;  %v413_v5 = vxor.u32 %v405_v55, %v1120_v31 }
  0x98   :  { %v441_v42 = vmul.u32 2221713035, %v433_v32  ;;  %vm1160_vm1 = vcmp.lt.s32.totalorder %v779_v35, 858993459  ;;  %v248_v58 = vshrl.u32 %v240_v37, 16  ;;  %v414_v11 = vxor.u32 %v406_v40, %v398_v17 }
  0x99   :  { %v244_v21 = vshrl.u32 %v236_v10, 16  ;;  %v243_v23 = vshrl.u32 %v235_v13, 16  ;;  %v450_v61 = vshrl.u32 %v442_v48, 16  ;;  %v419_v0 = vmul.u32 2146121005, %v411_v22  ;;  %vm819_vm4 = vmpackc.low %vm1160_vm1, %vm1153_vm0 }
  0x9a   :  { %v449_v53 = vshrl.u32 %v441_v42, 16  ;;  %v420_v1 = vmul.u32 2146121005, %v412_v43  ;;  %v421_v15 = vmul.u32 2146121005, %v413_v5  ;;  %v415_v16 = vxor.u32 %v407_v6, %v1128_v52  ;;  %v911_v52 = vld [vmem:[%s1324_s6 + $0x38] sm:$0xff] }
  0x9b   :  { %v252_v28 = vxor.u32 %v244_v21, %v236_v10  ;;  %v251_v34 = vxor.u32 %v243_v23, %v235_v13  ;;  %v458_v4 = vxor.u32 %v450_v61, %v442_v48  ;;  %v427_v8 = vshrl.u32 %v419_v0, 15  ;;  %577 = vmatpush.bf16.msrb.mxu0 %v911_v52  ;;  %920 = vmatpush.bf16.msra.mxu2 %v911_v52 }
  0x9c   :  { %v457_v63 = vxor.u32 %v449_v53, %v441_v42  ;;  %v428_v10 = vshrl.u32 %v420_v1, 15  ;;  %v422_v20 = vmul.u32 2146121005, %v414_v11  ;;  %v429_v21 = vshrl.u32 %v421_v15, 15 }
  0x9d   :  { %v777_v41 = vxor.u32 2147483648, %v252_v28  ;;  %v776_v46 = vxor.u32 2147483648, %v251_v34  ;;  %v829_v14 = vxor.u32 2147483648, %v458_v4  ;;  %v435_v55 = vxor.u32 %v427_v8, %v419_v0  ;;  %v908_v4 = vld [vmem:[%s1324_s6 + $0x20] sm:$0xff] }
  0x9e   :  { %v183_v49 = vpop.f32.mrf.mxu0  ;;  %v828_v7 = vxor.u32 2147483648, %v457_v63  ;;  %v436_v17 = vxor.u32 %v428_v10, %v420_v1  ;;  %v416_v22 = vxor.u32 %v408_v45, %v1135_v9  ;;  %v225_v24 = vshrl.u32 %v217_v47, 15 }
  0x9f   :  { %v184_v56 = vadd.f32 %v935_v33, %v183_v49  ;;  %vm1164_vm2 = vcmp.lt.s32.totalorder %v777_v41, 858993459  ;;  %vm1168_vm3 = vcmp.lt.s32.totalorder %v776_v46, 858993459  ;;  %vm1195_vm7 = vcmp.lt.s32.totalorder %v829_v14, 858993459  ;;  %578 = vmatpush.bf16.msrb.mxu0 %v910_v27  ;;  %921 = vmatpush.bf16.msra.mxu2 %v910_v27 }
  0xa0   :  { %vm816_vm5 = vmpackc.low %vm1164_vm2, %vm1168_vm3  ;;  %vm1186_vm6 = vcmp.lt.s32.totalorder %v828_v7, 858993459  ;;  %v226_v26 = vshrl.u32 %v218_v36, 15  ;;  %v443_v28 = vmul.u32 2221713035, %v435_v55  ;;  %v430_v29 = vshrl.u32 %v422_v20, 15 }
  0xa1   :  { %v283_v2 = vmax.f32 %v184_v56, 0.0  ;;  %vm868_vm8 = vmpackc.low %vm1195_vm7, %vm1186_vm6  ;;  %v444_v32 = vmul.u32 2221713035, %v436_v17  ;;  %v437_v33 = vxor.u32 %v429_v21, %v421_v15  ;;  %v423_v34 = vmul.u32 2146121005, %v415_v16  ;;  %v909_v56 = vld [vmem:[%s1324_s6 + $0x28] sm:$0xff] }
  0xa2   :  { %v424_v9 = vmul.u32 2146121005, %v416_v22  ;;  %v255_v35 = vxor.u32 %v247_v51, %v239_v30  ;;  %v256_v39 = vxor.u32 %v248_v58, %v240_v37  ;;  %v451_v40 = vshrl.u32 %v443_v28, 16 }
  0xa3   :  { %v1175_v13 = vpack.c.bf16 %v283_v2, %v283_v2  ;;  %v438_v41 = vxor.u32 %v430_v29, %v422_v20  ;;  %v452_v42 = vshrl.u32 %v444_v32, 16  ;;  %v445_v43 = vmul.u32 2221713035, %v437_v33  ;;  %579 = vmatpush.bf16.msrb.mxu0 %v909_v56  ;;  %922 = vmatpush.bf16.msra.mxu2 %v909_v56  ;;  %v907_v33 = vld [vmem:[%s1324_s6 + $0x18] sm:$0xff] }
  0xa4   :  { %v431_v45 = vshrl.u32 %v423_v34, 15  ;;  %v432_v46 = vshrl.u32 %v424_v9, 15  ;;  %v233_v48 = vxor.u32 %v225_v24, %v217_v47  ;;  %v234_v49 = vxor.u32 %v226_v26, %v218_v36 }
  0xa5   :  { %818 = vmatmul.msk.bf16.vlgmr.msra.gmra.mxu1 %vm816_vm5, %v1175_v13  ;;  %821 = vmatmul.msk.bf16.vlgmr.msra.gmra.mxu3 %vm819_vm4, %v1175_v13  ;;  %v459_v50 = vxor.u32 %v451_v40, %v443_v28  ;;  %v446_v53 = vmul.u32 2221713035, %v438_v41  ;;  %v460_v57 = vxor.u32 %v452_v42, %v444_v32  ;;  %v453_v12 = vshrl.u32 %v445_v43, 16 }
  0xa6   :  { %v185_v23 = vpop.f32.mrf.mxu0  ;;  %v439_v30 = vxor.u32 %v431_v45, %v423_v34  ;;  %v440_v37 = vxor.u32 %v432_v46, %v424_v9  ;;  %v780_v51 = vxor.u32 2147483648, %v255_v35  ;;  %v781_v58 = vxor.u32 2147483648, %v256_v39  ;;  %v906_v34 = vld [vmem:[%s1324_s6 + $0x10] sm:$0xff]  ;;  %v905_v9 = vld [vmem:[%s1324_s6 + $0x8] sm:$0xff]  ;;  %v936_v39 = vld [vmem:[%s1323_s5] ss:$0 sm:$0xff] }
  0xa7   :  { %v830_v61 = vxor.u32 2147483648, %v459_v50  ;;  %v454_v62 = vshrl.u32 %v446_v53, 16  ;;  %v831_v63 = vxor.u32 2147483648, %v460_v57  ;;  %v461_v0 = vxor.u32 %v453_v12, %v445_v43  ;;  %580 = vmatpush.bf16.msrb.mxu0 %v908_v4  ;;  %923 = vmatpush.bf16.msra.mxu2 %v908_v4 }
  0xa8   :  { %v447_v47 = vmul.u32 2221713035, %v439_v30  ;;  %v448_v36 = vmul.u32 2221713035, %v440_v37  ;;  %v241_v1 = vmul.u32 2221713035, %v233_v48 }
  0xa9   :  { %vm1212_vm9 = vcmp.lt.s32.totalorder %v830_v61, 858993459  ;;  %v462_v3 = vxor.u32 %v454_v62, %v446_v53  ;;  %vm1219_vm10 = vcmp.lt.s32.totalorder %v831_v63, 858993459  ;;  %v832_v7 = vxor.u32 2147483648, %v461_v0 }
  0xaa   :  { %v455_v8 = vshrl.u32 %v447_v47, 16  ;;  %v456_v10 = vshrl.u32 %v448_v36, 16  ;;  %vm1223_vm11 = vcmp.lt.s32.totalorder %v780_v51, 858993459  ;;  %v242_v14 = vmul.u32 2221713035, %v234_v49  ;;  %vm871_vm12 = vmpackc.low %vm1219_vm10, %vm1212_vm9 }
  0xab   :  { %v833_v15 = vxor.u32 2147483648, %v462_v3  ;;  %vm276_vm13 = vcmp.lt.s32.totalorder %v781_v58, 858993459  ;;  %vm1231_vm14 = vcmp.lt.s32.totalorder %v832_v7, 858993459  ;;  %v249_v22 = vshrl.u32 %v241_v1, 16  ;;  %581 = vmatpush.bf16.msrb.mxu0 %v907_v33  ;;  %924 = vmatpush.bf16.msra.mxu2 %v907_v33 }
  0xac   :  { %v463_v55 = vxor.u32 %v455_v8, %v447_v47  ;;  %v464_v17 = vxor.u32 %v456_v10, %v448_v36  ;;  %vm822_vm1 = vmpackc.low %vm276_vm13, %vm1223_vm11  ;;  %v250_v23 = vshrl.u32 %v242_v14, 16  ;;  %v606_v3 = vadd.s32 2445500225, %v1110_v19 }
  0xad   :  { %vm1235_vm15 = vcmp.lt.s32.totalorder %v833_v15, 858993459  ;;  %v257_v27 = vxor.u32 %v249_v22, %v241_v1  ;;  %v607_v5 = vadd.s32 2445500225, %v1107_v18  ;;  %v608_v10 = vadd.s32 2445500225, %v1085_v44 }
  0xae   :  { %vm874_vm0 = vmpackc.low %vm1235_vm15, %vm1231_vm14  ;;  %v834_v52 = vxor.u32 2147483648, %v463_v55  ;;  %v835_v21 = vxor.u32 2147483648, %v464_v17  ;;  %v258_v28 = vxor.u32 %v250_v23, %v242_v14  ;;  %v614_v4 = vshrl.u32 %v606_v3, 16 }
  0xaf   :  { %v782_v29 = vxor.u32 2147483648, %v257_v27  ;;  %582 = vmatpush.bf16.msrb.mxu0 %v906_v34  ;;  %925 = vmatpush.bf16.msra.mxu2 %v906_v34  ;;  %v615_v8 = vshrl.u32 %v607_v5, 16  ;;  %v616_v15 = vshrl.u32 %v608_v10, 16  ;;  %v609_v20 = vadd.s32 2445500225, %v1098_v60 }
  0xb0   :  { %vm1246_vm2 = vcmp.lt.s32.totalorder %v834_v52, 858993459  ;;  %vm1250_vm3 = vcmp.lt.s32.totalorder %v835_v21, 858993459  ;;  %v783_v32 = vxor.u32 2147483648, %v258_v28  ;;  %v622_v7 = vxor.u32 %v614_v4, %v606_v3 }
  0xb1   :  { %vm877_vm4 = vmpackc.low %vm1250_vm3, %vm1246_vm2  ;;  %vm279_vm5 = vcmp.lt.s32.totalorder %v782_v29, 858993459  ;;  %v623_v14 = vxor.u32 %v615_v8, %v607_v5  ;;  %v624_v17 = vxor.u32 %v616_v15, %v608_v10  ;;  %v617_v22 = vshrl.u32 %v609_v20, 16  ;;  %v1302_v60 = vld [vmem:[%s1325_s7] ss:$0 sm:$0xff]  ;;  %s965_s7 = smov [#allocation2]  }
  0xb2   :  { %vm282_vm11 = vcmp.lt.s32.totalorder %v783_v32, 858993459  ;;  %v630_v11 = vmul.u32 2146121005, %v622_v7  ;;  %v610_v18 = vadd.s32 2445500225, %v1092_v54 }
  0xb3   :  { %vm825_vm13 = vmpackc.low %vm282_vm11, %vm279_vm5  ;;  %583 = vmatpush.bf16.msrb.mxu0 %v905_v9  ;;  %926 = vmatpush.bf16.msra.mxu2 %v905_v9  ;;  %v631_v55 = vmul.u32 2146121005, %v623_v14  ;;  %v632_v19 = vmul.u32 2146121005, %v624_v17  ;;  %v625_v26 = vxor.u32 %v617_v22, %v609_v20  ;;  %v611_v9 = vadd.s32 2445500225, %v1095_v59 }
  0xb4   :  { %v638_v16 = vshrl.u32 %v630_v11, 15  ;;  %v618_v29 = vshrl.u32 %v610_v18, 16  ;;  %v612_v59 = vadd.s32 2445500225, %v1115_v25  ;;  %s730_s23 = sshll.u32 %s965_s7, 4  ;;  %s731_s23 = int_to_ptr.vmem [resolvable:$true] %s730_s23 }
  0xb5   :  { %824 = vmatmul.msk.bf16.gmra.mxu3 %vm822_vm1, %v1175_v13  ;;  %v639_v21 = vshrl.u32 %v631_v55, 15  ;;  %v640_v28 = vshrl.u32 %v632_v19, 15  ;;  %v633_v34 = vmul.u32 2146121005, %v625_v26 }
  0xb6   :  { %v646_v52 = vxor.u32 %v638_v16, %v630_v11 }
  0xb7   :  { %v647_v24 = vxor.u32 %v639_v21, %v631_v55  ;;  %v648_v33 = vxor.u32 %v640_v28, %v632_v19 }
  0xb8   :  { %v654_v23 = vmul.u32 2221713035, %v646_v52 }
  0xb9   :  { %v655_v44 = vmul.u32 2221713035, %v647_v24  ;;  %v656_v54 = vmul.u32 2221713035, %v648_v33 }
  0xba   :  { %v662_v27 = vshrl.u32 %v654_v23, 16 }
  0xbc   :  { %v670_v32 = vxor.u32 %v662_v27, %v654_v23 }
  0xc5   :  { %827 = vmatmul.msk.bf16.gmra.mxu3 %vm825_vm13, %v1175_v13  ;;  %v904_v13 = vld [vmem:[%s1324_s6] sm:$0xff] }
  0xc6   :  { %584 = vmatpush.bf16.msrb.mxu0 %v904_v13  ;;  %927 = vmatpush.bf16.msra.mxu2 %v904_v13  ;;  %v663_v13 = vshrl.u32 %v655_v44, 16 }
 0x122   :  { %v373_v35 = vpop.f32.mrf.mxu1 }
 0x123   :  { %v374_v41 = vadd.f32 %v936_v39, %v373_v35  ;;  %v626_v35 = vxor.u32 %v618_v29, %v610_v18 }
 0x125   :  { %v489_v45 = vmax.f32 %v374_v41, 0.0  ;;  %v641_v41 = vshrl.u32 %v633_v34, 15 }
 0x128   :  { %v378_v40 = vpop.f32.mrf.mxu3 }
 0x129   :  { %v379_v48 = vadd.f32 %v936_v39, %v378_v40  ;;  %v880_v40 = vxor.u32 2147483648, %v670_v32 }
 0x12a   :  { %v375_v42 = vpop.f32.mrf.mxu1 }
 0x12b   :  { %v376_v43 = vadd.f32 %v936_v39, %v375_v42  ;;  %v491_v56 = vmax.f32 %v379_v48, 0.0  ;;  %vm680_vm6 = vcmp.lt.s32.totalorder %v880_v40, 858993459  ;;  %v664_v48 = vshrl.u32 %v656_v54, 16 }
 0x12d   :  { %v490_v46 = vmax.f32 %v376_v43, 0.0  ;;  %v619_v43 = vshrl.u32 %v611_v9, 16 }
 0x12f   :  { %v869_v49 = vpack.c.bf16 %v490_v46, %v489_v45  ;;  %v671_v46 = vxor.u32 %v663_v13, %v655_v44 }
 0x130   :  { %v380_v50 = vpop.f32.mrf.mxu3 }
 0x131   :  { %v381_v53 = vadd.f32 %v936_v39, %v380_v50  ;;  %870 = vmatmul.msk.bf16.vlgmr.msrb.gmra.mxu0 %vm868_vm8, %v869_v49  ;;  %v649_v49 = vxor.u32 %v641_v41, %v633_v34  ;;  %v634_v50 = vmul.u32 2146121005, %v626_v35 }
 0x133   :  { %v492_v57 = vmax.f32 %v381_v53, 0.0 }
 0x135   :  { %v872_v12 = vpack.c.bf16 %v492_v57, %v491_v56  ;;  %v627_v56 = vxor.u32 %v619_v43, %v611_v9 }
 0x137   :  { %873 = vmatmul.msk.bf16.vlgmr.msra.gmra.mxu2 %vm871_vm12, %v872_v12  ;;  %v881_v12 = vxor.u32 2147483648, %v671_v46 }
 0x138   :  { %v383_v30 = vpop.f32.mrf.mxu3 }
 0x139   :  { %v384_v37 = vadd.f32 %v936_v39, %v383_v30  ;;  %v672_v30 = vxor.u32 %v664_v48, %v656_v54  ;;  %vm683_vm7 = vcmp.lt.s32.totalorder %v881_v12, 858993459 }
 0x13b   :  { %v493_v61 = vmax.f32 %v384_v37, 0.0  ;;  %v657_v37 = vmul.u32 2221713035, %v649_v49 }
 0x140   :  { %v385_v51 = vpop.f32.mrf.mxu3 }
 0x141   :  { %v386_v58 = vadd.f32 %v936_v39, %v385_v51  ;;  %v642_v51 = vshrl.u32 %v634_v50, 15 }
 0x143   :  { %v494_v62 = vmax.f32 %v386_v58, 0.0 }
 0x145   :  { %v875_v6 = vpack.c.bf16 %v494_v62, %v493_v61  ;;  %v620_v61 = vshrl.u32 %v612_v59, 16 }
 0x147   :  { %876 = vmatmul.msk.bf16.gmra.mxu2 %vm874_vm0, %v875_v6  ;;  %v635_v6 = vmul.u32 2146121005, %v627_v56  ;;  %v628_v25 = vxor.u32 %v620_v61, %v612_v59 }
 0x148   :  { %v388_v31 = vpop.f32.mrf.mxu3 }
 0x149   :  { %v389_v63 = vadd.f32 %v936_v39, %v388_v31  ;;  %v643_v7 = vshrl.u32 %v635_v6, 15  ;;  %v636_v55 = vmul.u32 2146121005, %v628_v25 }
 0x14b   :  { %v495_v36 = vmax.f32 %v389_v63, 0.0  ;;  %v882_v63 = vxor.u32 2147483648, %v672_v30  ;;  %v651_v16 = vxor.u32 %v643_v7, %v635_v6  ;;  %v644_v22 = vshrl.u32 %v636_v55, 15 }
 0x14d   :  { %vm686_vm8 = vcmp.lt.s32.totalorder %v882_v63, 858993459  ;;  %v652_v26 = vxor.u32 %v644_v22, %v636_v55 }
 0x14f   :  { %v660_v32 = vmul.u32 2221713035, %v652_v26 }
 0x150   :  { %v390_v0 = vpop.f32.mrf.mxu3 }
 0x151   :  { %v391_v47 = vadd.f32 %v936_v39, %v390_v0  ;;  %v665_v0 = vshrl.u32 %v657_v37, 16  ;;  %v668_v35 = vshrl.u32 %v660_v32, 16 }
 0x153   :  { %v496_v1 = vmax.f32 %v391_v47, 0.0  ;;  %v650_v47 = vxor.u32 %v642_v51, %v634_v50  ;;  %v673_v4 = vxor.u32 %v665_v0, %v657_v37  ;;  %v676_v41 = vxor.u32 %v668_v35, %v660_v32 }
 0x155   :  { %v878_v2 = vpack.c.bf16 %v496_v1, %v495_v36  ;;  %v658_v5 = vmul.u32 2221713035, %v650_v47  ;;  %v883_v14 = vxor.u32 2147483648, %v673_v4  ;;  %v886_v46 = vxor.u32 2147483648, %v676_v41 }
 0x157   :  { %879 = vmatmul.msk.bf16.gmra.mxu2 %vm877_vm4, %v878_v2  ;;  %v613_v2 = vadd.s32 2445500225, %v1123_v38  ;;  %v666_v15 = vshrl.u32 %v658_v5, 16  ;;  %vm689_vm9 = vcmp.lt.s32.totalorder %v883_v14, 858993459 }
 0x158   :  { %v659_v38 = vmul.u32 2221713035, %v651_v16  ;;  %vm698_vm14 = vcmp.lt.s32.totalorder %v886_v46, 858993459 }
 0x159   :  { %v621_v10 = vshrl.u32 %v613_v2, 16  ;;  %v674_v21 = vxor.u32 %v666_v15, %v658_v5 }
 0x15a   :  { %v667_v18 = vshrl.u32 %v659_v38, 16 }
 0x15b   :  { %v629_v20 = vxor.u32 %v621_v10, %v613_v2  ;;  %v884_v24 = vxor.u32 2147483648, %v674_v21 }
 0x15c   :  { %v675_v29 = vxor.u32 %v667_v18, %v659_v38 }
 0x15d   :  { %v637_v27 = vmul.u32 2146121005, %v629_v20  ;;  %vm692_vm10 = vcmp.lt.s32.totalorder %v884_v24, 858993459 }
 0x15e   :  { %v885_v13 = vxor.u32 2147483648, %v675_v29 }
 0x15f   :  { %v645_v33 = vshrl.u32 %v637_v27, 15 }
 0x160   :  { %vm695_vm12 = vcmp.lt.s32.totalorder %v885_v13, 858993459 }
 0x1ae   :  { %v586_v39 = vpop.f32.mrf.mxu0 }
 0x1af   :  { %v587_v42 = vadd.f32 %v1302_v60, %v586_v39  ;;  %v653_v39 = vxor.u32 %v645_v33, %v637_v27 }
 0x1b1   :  { %v702_v45 = vmax.f32 %v587_v42, 0.0  ;;  %v661_v42 = vmul.u32 2221713035, %v653_v39 }
 0x1b3   :  { %v710_v53 = vsel %vm680_vm6, %v702_v45, 0.0  ;;  %v669_v48 = vshrl.u32 %v661_v42, 16 }
 0x1b4   :  { %718 = vst [vmem:[#allocation2] sm:$0xff] %v710_v53 }
 0x1b5   :  { %v677_v53 = vxor.u32 %v669_v48, %v661_v42 }
 0x1b6   :  { %v588_v57 = vpop.f32.mrf.mxu0 }
 0x1b7   :  { %v589_v58 = vadd.f32 %v1302_v60, %v588_v57  ;;  %v887_v57 = vxor.u32 2147483648, %v677_v53 }
 0x1b9   :  { %v703_v62 = vmax.f32 %v589_v58, 0.0  ;;  %vm701_vm15 = vcmp.lt.s32.totalorder %v887_v57, 858993459 }
 0x1ba   :  { %v591_v31 = vpop.f32.mrf.mxu2 }
 0x1bb   :  { %v711_v36 = vsel %vm683_vm7, %v703_v62, 0.0  ;;  %v592_v1 = vadd.f32 %v1302_v60, %v591_v31 }
 0x1bc   :  { %719 = vst [vmem:[#allocation2 + $0x8] sm:$0xff] %v711_v36 }
 0x1bd   :  { %v704_v3 = vmax.f32 %v592_v1, 0.0 }
 0x1bf   :  { %v712_v8 = vsel %vm686_vm8, %v704_v3, 0.0 }
 0x1c0   :  { %720 = vst [vmem:[#allocation2 + $0x10] sm:$0xff] %v712_v8 }
 0x1c2   :  { %v593_v11 = vpop.f32.mrf.mxu2 }
 0x1c3   :  { %v594_v17 = vadd.f32 %v1302_v60, %v593_v11 }
 0x1c5   :  { %v705_v52 = vmax.f32 %v594_v17, 0.0 }
 0x1c7   :  { %v713_v23 = vsel %vm689_vm9, %v705_v52, 0.0 }
 0x1c8   :  { %721 = vst [vmem:[#allocation2 + $0x18] sm:$0xff] %v713_v23 }
 0x1ca   :  { %v596_v19 = vpop.f32.mrf.mxu2 }
 0x1cb   :  { %v597_v28 = vadd.f32 %v1302_v60, %v596_v19 }
 0x1cd   :  { %v706_v44 = vmax.f32 %v597_v28, 0.0 }
 0x1cf   :  { %v714_v34 = vsel %vm692_vm10, %v706_v44, 0.0 }
 0x1d0   :  { %722 = vst [vmem:[#allocation2 + $0x20] sm:$0xff] %v714_v34 }
 0x1d2   :  { %v598_v9 = vpop.f32.mrf.mxu2 }
 0x1d3   :  { %v599_v40 = vadd.f32 %v1302_v60, %v598_v9 }
 0x1d5   :  { %v707_v54 = vmax.f32 %v599_v40, 0.0 }
 0x1d7   :  { %v715_v43 = vsel %vm695_vm12, %v707_v54, 0.0 }
 0x1d8   :  { %723 = vst [vmem:[#allocation2 + $0x28] sm:$0xff] %v715_v43 }
 0x1da   :  { %v601_v45 = vpop.f32.mrf.mxu2 }
 0x1db   :  { %v602_v49 = vadd.f32 %v1302_v60, %v601_v45 }
 0x1dd   :  { %v708_v50 = vmax.f32 %v602_v49, 0.0 }
 0x1df   :  { %v716_v56 = vsel %vm698_vm14, %v708_v50, 0.0 }
 0x1e0   :  { %724 = vst [vmem:[#allocation2 + $0x30] sm:$0xff] %v716_v56 }
 0x1e2   :  { %v603_v59 = vpop.f32.mrf.mxu2 }
 0x1e3   :  { %v604_v12 = vadd.f32 %v1302_v60, %v603_v59 }
 0x1e5   :  { %v709_v30 = vmax.f32 %v604_v12, 0.0 }
 0x1e7   :  { %v717_v37 = vsel %vm701_vm15, %v709_v30, 0.0 }
 0x1e8   :  { %725 = vst [vmem:[#allocation2 + $0x38] sm:$0xff] %v717_v37 }
 0x1e9   :  { %738 = dma.vmem_to_hbm [thread:$0]  %s731_s23, 1024, %s733_s26, [#allocation3], %s966_s27, %s966_s27, %s967_s28  }
 0x1ea   :  { %962 = dma.done.wait [#allocation3], 1024  }
 0x1eb   :  { %963 = vsyncadd [#allocation3], 4294966272 }
 0x1ec   :  { %743 = vsyncpa [#allocation3], 1 }

</bundles_post_ra>
